<compile_context>
chip_gen: v7x
topology: tpu7x:2x2x1
jax: 0.10.0
libtpu: 0.0.40
codegen_flags: <defaults>
</compile_context>

<pallas_src>
import functools

import jax
import jax.numpy as jnp
from jax import lax
from jax.experimental import pallas as pl
from jax.experimental.pallas import tpu as pltpu

_UNROLL_T = 32                      # fully unroll in-kernel time loops up to this T
_VMEM_LIMIT = 32 * 1024 * 1024      # explicit scoped-VMEM limit (safe on v5e/v6e/v7x)
_TILE_BUDGET = 12 * 1024 * 1024     # per-vocab-tile working-set budget for fc_out


def _round_up(x, m):
    return ((x + m - 1) // m) * m


def _pick_v_tile(vocab_size, m_rows, hidden,
                 budget_bytes=_TILE_BUDGET, max_tv=2048):
    """Budget-derived fc_out vocab tile (multiple of 128) and padded vocab."""
    resident = m_rows * hidden * 2                         # bf16 h_seq stays resident
    tv = max_tv
    while tv > 128:
        # double-buffered: w_out tile (bf16) + b_out tile (f32) + out tile (f32)
        per_tile = 2 * (hidden * tv * 2 + tv * 4 + m_rows * tv * 4)
        if resident + per_tile <= budget_bytes:
            break
        tv -= 128
    tv = max(128, min(tv, _round_up(vocab_size, 128)))
    return tv, _round_up(vocab_size, tv)


def _lstm_gates(gates, c_prev, H):
    # TODO(synk): for small H (< 128) the gate column slices lower to lane
    # shuffles; at production H (multiple of 128) they are free.
    i_g = jax.nn.sigmoid(gates[:, 0 * H:1 * H])
    f_g = jax.nn.sigmoid(gates[:, 1 * H:2 * H])
    g_g = jnp.tanh(gates[:, 2 * H:3 * H])
    o_g = jax.nn.sigmoid(gates[:, 3 * H:4 * H])
    c_new = f_g * c_prev + i_g * g_g
    h_new = o_g * jnp.tanh(c_new)
    return h_new, c_new


# ----------------------- teacher_forcer: pass 1 (recurrence) -----------------------

def _make_recurrence_kernel(T, B, E, H):
    """Runs the whole LSTM recurrence once; h/c live in registers."""

    def kernel(x_ref, wih_ref, whh_ref, b_ref, hseq_ref, xproj_s):
        # Batched input projection for all timesteps: one (T*B, E) @ (E, 4H) GEMM.
        xproj_s[...] = (jnp.dot(x_ref[...], wih_ref[...],
                                preferred_element_type=jnp.float32)
                        + b_ref[...])

        w_hh = whh_ref[...]                       # hoisted out of the time loop

        def cell(x_proj_t, h, c):
            gates = x_proj_t + jnp.dot(h, w_hh,
                                       preferred_element_type=jnp.float32)
            return _lstm_gates(gates, c, H)

        h0 = jnp.zeros((B, H), jnp.float32)
        c0 = jnp.zeros((B, H), jnp.float32)

        if T <= _UNROLL_T:
            h, c = h0, c0
            for t in range(T):                    # fully static indexing
                h, c = cell(xproj_s[t * B:(t + 1) * B, :], h, c)
                hseq_ref[t * B:(t + 1) * B, :] = h
        else:
            def body(t, carry):
                h, c = carry
                start = pl.multiple_of(t * B, B)
                h, c = cell(xproj_s[pl.ds(start, B), :], h, c)
                hseq_ref[pl.ds(start, B), :] = h
                return (h, c)
            lax.fori_loop(0, T, body, (h0, c0), unroll=4)

    return kernel


# ----------------------- teacher_forcer: pass 2 (fc_out GEMM) ----------------------

def _fc_out_kernel(h_ref, w_ref, b_ref, out_ref):
    # One (B*T, H) @ (H, TV) bf16 GEMM per vocab tile, f32 accumulation.
    # TODO(synk): tile the B*T row axis too if production B*T becomes very large.
    out_ref[...] = (jnp.dot(h_ref[...], w_ref[...],
                            preferred_element_type=jnp.float32) + b_ref[...])


# ------------------------------- simple (greedy) mode ------------------------------

def _make_simple_kernel(T, E, H, V):
    """Single grid step; greedy argmax feedback; h/c/out are register values."""

    def kernel(feat_ref, emb_ref, wih_ref, whh_ref, b_ref,
               wout_ref, bout_ref, out_ref):
        # Hoist all weights out of the time loop (loads are not re-issued per step).
        w_ih = wih_ref[...]
        w_hh = whh_ref[...]
        b = b_ref[...]
        w_out = wout_ref[...]
        b_out = bout_ref[...]
        emb = emb_ref[...]

        def cell(x, h, c):
            gates = (jnp.dot(x, w_ih, preferred_element_type=jnp.float32)
                     + jnp.dot(h, w_hh, preferred_element_type=jnp.float32) + b)
            return _lstm_gates(gates, c, H)

        def fc(h):
            return jnp.dot(h, w_out, preferred_element_type=jnp.float32) + b_out

        def feedback(out):
            # next input = embed(argmax(out, 1)); argmax as first-index-of-max,
            # lookup as one-hot @ table (fine at demo vocab).
            # TODO(synk): at production vocab keep the embedding table in HBM
            # (memory_space=pl.ANY) and gather the B rows with per-row async
            # copies; tile w_out with a running (max, argmax) reduction so the
            # full logits never have to be VMEM-resident.
            Bq = out.shape[0]
            iota = lax.broadcasted_iota(jnp.int32, (Bq, V), 1)
            mx = jnp.max(out, axis=1, keepdims=True)
            first_idx = jnp.min(jnp.where(out == mx, iota, V),
                                axis=1, keepdims=True)          # (B, 1)
            onehot = (iota == first_idx).astype(jnp.float32)
            return jnp.dot(onehot, emb, preferred_element_type=jnp.float32)

        B = feat_ref.shape[0]
        h = jnp.zeros((B, H), jnp.float32)
        c = jnp.zeros((B, H), jnp.float32)

        # step 0: input = features (no select, no wasted feedback at the tail).
        h, c = cell(feat_ref[...], h, c)
        out = fc(h)
        out_ref[0] = out

        if T <= _UNROLL_T:
            for t in range(1, T):
                x = feedback(out)
                h, c = cell(x, h, c)
                out = fc(h)
                out_ref[t] = out
        else:
            def body(t, carry):
                h, c, out_prev = carry
                x = feedback(out_prev)
                h, c = cell(x, h, c)
                out = fc(h)
                out_ref[t] = out
                return (h, c, out)
            lax.fori_loop(1, T, body, (h, c, out), unroll=4)

    return kernel


# ------------------------------------ parameters -----------------------------------

def init_params(key, embed_size, hidden_size, vocab_size):
    ks = jax.random.split(key, 6)
    s = 0.1
    # Weights stored pre-transposed for x @ W layout; b_lstm is the pre-summed
    # b_ih + b_hh (parameter import from PyTorch must replicate this).
    return {
        "embed": jax.random.normal(ks[0], (vocab_size, embed_size), jnp.float32),
        "w_ih_t": s * jax.random.normal(ks[1], (embed_size, 4 * hidden_size), jnp.float32),
        "w_hh_t": s * jax.random.normal(ks[2], (hidden_size, 4 * hidden_size), jnp.float32),
        "b_lstm": s * jax.random.normal(ks[3], (1, 4 * hidden_size), jnp.float32),
        "w_out_t": s * jax.random.normal(ks[4], (hidden_size, vocab_size), jnp.float32),
        "b_out": s * jax.random.normal(ks[5], (1, vocab_size), jnp.float32),
    }


# ------------------------------------- forward -------------------------------------

@functools.partial(jax.jit, static_argnames=("forward_approach",))
def decoder_rnn_forward(features, captions, params, forward_approach):
    B, E = features.shape
    T = captions.shape[1]
    V = params["embed"].shape[0]
    H = params["w_hh_t"].shape[0]

    if forward_approach == "teacher_forcer":
        # Pre-shifted, time-major input: x_0 = features, x_t = embed(captions[:, t-1]).
        # The embedding gather stays in XLA; the (V, E) table never enters VMEM.
        ids_tm = captions.astype(jnp.int32).T                      # (T, B)
        cap_emb_tm = jnp.take(params["embed"], ids_tm, axis=0)     # (T, B, E)
        x_seq = jnp.concatenate([features[None], cap_emb_tm[:-1]], axis=0)
        x_flat = x_seq.reshape(T * B, E)

        # ---- pass 1: LSTM recurrence, computed exactly once ----
        h_seq = pl.pallas_call(
            _make_recurrence_kernel(T, B, E, H),
            out_shape=jax.ShapeDtypeStruct((T * B, H), jnp.float32),
            grid=(1,),
            in_specs=[
                pl.BlockSpec((T * B, E), lambda i: (0, 0)),        # shifted inputs
                pl.BlockSpec((E, 4 * H), lambda i: (0, 0)),        # W_ih^T
                pl.BlockSpec((H, 4 * H), lambda i: (0, 0)),        # W_hh^T
                pl.BlockSpec((1, 4 * H), lambda i: (0, 0)),        # b_ih + b_hh
            ],
            out_specs=pl.BlockSpec((T * B, H), lambda i: (0, 0)),
            scratch_shapes=[pltpu.VMEM((T * B, 4 * H), jnp.float32)],  # x-projection
            compiler_params=pltpu.CompilerParams(
                dimension_semantics=("arbitrary",),
                vmem_limit_bytes=_VMEM_LIMIT),
        )(x_flat, params["w_ih_t"], params["w_hh_t"], params["b_lstm"])

        # Transpose h_seq to batch-major while it is still tiny (T*B*H elements),
        # so the big GEMM below writes (B, T, V) directly — no logit-sized
        # transpose through HBM.
        h_bt = jnp.transpose(h_seq.reshape(T, B, H), (1, 0, 2)).reshape(B * T, H)
        h_bt = h_bt.astype(jnp.bfloat16)

        # ---- pass 2: V-tiled fc_out GEMM (bf16 inputs, f32 accumulation) ----
        M = B * T
        TV, V_pad = _pick_v_tile(V, M, H)
        w_out = params["w_out_t"].astype(jnp.bfloat16)
        b_out = params["b_out"]
        if V_pad != V:
            w_out = jnp.pad(w_out, ((0, 0), (0, V_pad - V)))
            b_out = jnp.pad(b_out, ((0, 0), (0, V_pad - V)))

        logits = pl.pallas_call(
            _fc_out_kernel,
            out_shape=jax.ShapeDtypeStruct((M, V_pad), jnp.float32),
            grid=(V_pad // TV,),
            in_specs=[
                pl.BlockSpec((M, H), lambda v: (0, 0)),            # h_seq (resident)
                pl.BlockSpec((H, TV), lambda v: (0, v)),           # W_out^T tile
                pl.BlockSpec((1, TV), lambda v: (0, v)),           # b_out tile
            ],
            out_specs=pl.BlockSpec((M, TV), lambda v: (0, v)),
            compiler_params=pltpu.CompilerParams(
                dimension_semantics=("parallel",),                  # megacore on v7x
                vmem_limit_bytes=_VMEM_LIMIT),
        )(h_bt, w_out, b_out)

        return logits.reshape(B, T, V_pad)[:, :, :V]

    elif forward_approach == "simple":
        V_pad = _round_up(V, 128)
        emb = params["embed"]
        w_out = params["w_out_t"]
        b_out = params["b_out"]
        if V_pad != V:
            emb = jnp.pad(emb, ((0, V_pad - V), (0, 0)))
            w_out = jnp.pad(w_out, ((0, 0), (0, V_pad - V)))
            # huge negative bias so padded columns can never win the greedy argmax
            b_out = jnp.pad(b_out, ((0, 0), (0, V_pad - V)), constant_values=-1e30)

        out_tm = pl.pallas_call(
            _make_simple_kernel(T, E, H, V_pad),
            out_shape=jax.ShapeDtypeStruct((T, B, V_pad), jnp.float32),
            grid=(1,),
            in_specs=[
                pl.BlockSpec((B, E), lambda i: (0, 0)),             # features
                pl.BlockSpec((V_pad, E), lambda i: (0, 0)),         # embed table (feedback)
                pl.BlockSpec((E, 4 * H), lambda i: (0, 0)),         # W_ih^T
                pl.BlockSpec((H, 4 * H), lambda i: (0, 0)),         # W_hh^T
                pl.BlockSpec((1, 4 * H), lambda i: (0, 0)),         # b_ih + b_hh
                pl.BlockSpec((H, V_pad), lambda i: (0, 0)),         # W_out^T (full V: argmax)
                pl.BlockSpec((1, V_pad), lambda i: (0, 0)),         # b_out
            ],
            out_specs=pl.BlockSpec((T, B, V_pad), lambda i: (0, 0, 0)),
            compiler_params=pltpu.CompilerParams(
                dimension_semantics=("arbitrary",),
                vmem_limit_bytes=_VMEM_LIMIT),
        )(features, emb, params["w_ih_t"], params["w_hh_t"], params["b_lstm"],
          w_out, b_out)

        return jnp.transpose(out_tm, (1, 0, 2))[:, :, :V]

    else:
        raise ValueError(f"unknown forward_approach: {forward_approach}")


# ----------------------------- pure-JAX references -----------------------------

def _reference_teacher(features, captions, params):
    cap_emb = jnp.take(params["embed"], captions.astype(jnp.int32), axis=0)
    cap_emb_tm = jnp.transpose(cap_emb, (1, 0, 2))             # (T, B, E)
    x_seq = jnp.concatenate([features[None], cap_emb_tm[:-1]], axis=0)
    H = params["w_hh_t"].shape[0]

    def step(carry, x_t):
        h, c = carry
        gates = x_t @ params["w_ih_t"] + h @ params["w_hh_t"] + params["b_lstm"]
        i = jax.nn.sigmoid(gates[:, 0 * H:1 * H])
        f = jax.nn.sigmoid(gates[:, 1 * H:2 * H])
        g = jnp.tanh(gates[:, 2 * H:3 * H])
        o = jax.nn.sigmoid(gates[:, 3 * H:4 * H])
        c = f * c + i * g
        h = o * jnp.tanh(c)
        return (h, c), h @ params["w_out_t"] + params["b_out"]

    B = features.shape[0]
    init = (jnp.zeros((B, H), jnp.float32), jnp.zeros((B, H), jnp.float32))
    _, outs = lax.scan(step, init, x_seq)                      # (T, B, V)
    return jnp.transpose(outs, (1, 0, 2))


def _reference_simple(features, params, T):
    H = params["w_hh_t"].shape[0]
    B = features.shape[0]

    def step(carry, _):
        h, c, x = carry
        gates = x @ params["w_ih_t"] + h @ params["w_hh_t"] + params["b_lstm"]
        i = jax.nn.sigmoid(gates[:, 0 * H:1 * H])
        f = jax.nn.sigmoid(gates[:, 1 * H:2 * H])
        g = jnp.tanh(gates[:, 2 * H:3 * H])
        o = jax.nn.sigmoid(gates[:, 3 * H:4 * H])
        c = f * c + i * g
        h = o * jnp.tanh(c)
        out = h @ params["w_out_t"] + params["b_out"]
        x_next = jnp.take(params["embed"], jnp.argmax(out, axis=1), axis=0)
        return (h, c, x_next), out

    init = (jnp.zeros((B, H), jnp.float32), jnp.zeros((B, H), jnp.float32), features)
    _, outs = lax.scan(step, init, None, length=T)             # (T, B, V)
    return jnp.transpose(outs, (1, 0, 2))


if __name__ == "__main__":
    B, T = 8, 8
    embed_size, hidden_size, vocab_size = 32, 32, 128

    key = jax.random.PRNGKey(0)
    k_p, k_f, k_c, k_p2 = jax.random.split(key, 4)
    params = init_params(k_p, embed_size, hidden_size, vocab_size)
    features = jax.random.normal(k_f, (B, embed_size), jnp.float32)
    captions = jax.random.randint(k_c, (B, T), 0, vocab_size, jnp.int32)

    # teacher_forcer path — deterministic, checked against the pure-JAX reference.
    out_tf = jax.block_until_ready(
        decoder_rnn_forward(features, captions, params, "teacher_forcer"))
    ref_tf = jax.block_until_ready(_reference_teacher(features, captions, params))
    assert out_tf.shape == (B, T, vocab_size)
    assert jnp.allclose(out_tf, ref_tf, atol=2e-2, rtol=2e-2)

    # teacher_forcer with a non-128-multiple vocab (exercises V padding / tiling).
    v_odd = 100
    params_odd = init_params(k_p2, embed_size, hidden_size, v_odd)
    captions_odd = captions % v_odd
    out_odd = jax.block_until_ready(
        decoder_rnn_forward(features, captions_odd, params_odd, "teacher_forcer"))
    ref_odd = jax.block_until_ready(_reference_teacher(features, captions_odd, params_odd))
    assert out_odd.shape == (B, T, v_odd)
    assert jnp.allclose(out_odd, ref_odd, atol=2e-2, rtol=2e-2)

    # simple (greedy argmax feedback) path — check shape, finiteness and the
    # t == 0 step against the reference (later steps may legitimately diverge
    # on argmax near-ties under different matmul precisions).
    out_s = jax.block_until_ready(
        decoder_rnn_forward(features, captions, params, "simple"))
    ref_s = jax.block_until_ready(_reference_simple(features, params, T))
    assert out_s.shape == (B, T, vocab_size)
    assert bool(jnp.isfinite(out_s).all())
    assert jnp.allclose(out_s[:, 0, :], ref_s[:, 0, :], atol=2e-2, rtol=2e-2)

    print("KERNEL_OK")
</pallas_src>

<mosaic_0001>
module attributes {stable_mosaic.version = 11 : i64} {
  func.func @kernel(%arg0: i32, %arg1: memref<64x32xf32, #tpu.memory_space<vmem>>, %arg2: memref<32x128xf32, #tpu.memory_space<vmem>>, %arg3: memref<32x128xf32, #tpu.memory_space<vmem>>, %arg4: memref<1x128xf32, #tpu.memory_space<vmem>>, %arg5: memref<64x32xf32, #tpu.memory_space<vmem>>, %arg6: memref<64x128xf32, #tpu.memory_space<vmem>>) attributes {dimension_semantics = [#tpu.dimension_semantics<arbitrary>], iteration_bounds = array<i64: 1>, scalar_prefetch = 0 : i64, scratch_operands = 1 : i64, tpu.core_type = #tpu.core_type<tc>, window_params = [{pipeline_mode = #tpu.pipeline_mode<synchronous>, transform_indices = @transform_0, window_bounds = array<i64: 64, 32>}, {pipeline_mode = #tpu.pipeline_mode<synchronous>, transform_indices = @transform_1, window_bounds = array<i64: 32, 128>}, {pipeline_mode = #tpu.pipeline_mode<synchronous>, transform_indices = @transform_2, window_bounds = array<i64: 32, 128>}, {pipeline_mode = #tpu.pipeline_mode<synchronous>, transform_indices = @transform_3, window_bounds = array<i64: 1, 128>}, {pipeline_mode = #tpu.pipeline_mode<synchronous>, transform_indices = @transform_4, window_bounds = array<i64: 64, 32>}]} {
    %c0 = arith.constant 0 : index
    %c0_0 = arith.constant 0 : index
    %0 = vector.load %arg1[%c0, %c0_0] : memref<64x32xf32, #tpu.memory_space<vmem>>, vector<64x32xf32>
    %c0_1 = arith.constant 0 : index
    %c0_2 = arith.constant 0 : index
    %1 = vector.load %arg2[%c0_1, %c0_2] : memref<32x128xf32, #tpu.memory_space<vmem>>, vector<32x128xf32>
    %cst = arith.constant dense<0.000000e+00> : vector<64x128xf32>
    %2 = tpu.matmul %0, %1, %cst {dimension_numbers = #tpu.dot_dimension_numbers<[1], [0], [0], [1], [0, 0, 1, 1], [], []>} : vector<64x32xf32>, vector<32x128xf32>, vector<64x128xf32> -> vector<64x128xf32>
    %c0_3 = arith.constant 0 : index
    %c0_4 = arith.constant 0 : index
    %3 = vector.load %arg4[%c0_3, %c0_4] : memref<1x128xf32, #tpu.memory_space<vmem>>, vector<1x128xf32>
    %4 = vector.broadcast %3 : vector<1x128xf32> to vector<64x128xf32>
    %5 = arith.addf %2, %4 : vector<64x128xf32>
    %c0_5 = arith.constant 0 : index
    %c0_6 = arith.constant 0 : index
    %6 = vector.load %arg6[%c0_5, %c0_6] : memref<64x128xf32, #tpu.memory_space<vmem>>, vector<64x128xf32>
    tpu.vector_store %arg6[%c0_5, %c0_6], %5 {strides = array<i32>} : memref<64x128xf32, #tpu.memory_space<vmem>>, vector<64x128xf32>,
    %c0_7 = arith.constant 0 : index
    %c0_8 = arith.constant 0 : index
    %7 = vector.load %arg3[%c0_7, %c0_8] : memref<32x128xf32, #tpu.memory_space<vmem>>, vector<32x128xf32>
    %cst_9 = arith.constant 0.000000e+00 : f32
    %8 = vector.broadcast %cst_9 : f32 to vector<8x32xf32>
    %cst_10 = arith.constant 0.000000e+00 : f32
    %9 = vector.broadcast %cst_10 : f32 to vector<8x32xf32>
    %c0_11 = arith.constant 0 : index
    %c0_12 = arith.constant 0 : index
    %10 = vector.load %arg6[%c0_11, %c0_12] : memref<64x128xf32, #tpu.memory_space<vmem>>, vector<8x128xf32>
    %cst_13 = arith.constant dense<0.000000e+00> : vector<8x128xf32>
    %11 = tpu.matmul %8, %7, %cst_13 {dimension_numbers = #tpu.dot_dimension_numbers<[1], [0], [0], [1], [0, 0, 1, 1], [], []>} : vector<8x32xf32>, vector<32x128xf32>, vector<8x128xf32> -> vector<8x128xf32>
    %12 = arith.addf %10, %11 : vector<8x128xf32>
    %13 = vector.extract_strided_slice %12 {offsets = [0, 0], sizes = [8, 32], strides = [1, 1]} : vector<8x128xf32> to vector<8x32xf32>
    %14 = arith.negf %13 : vector<8x32xf32>
    %15 = math.exp %14 : vector<8x32xf32>
    %cst_14 = arith.constant 1.000000e+00 : f32
    %16 = vector.broadcast %cst_14 : f32 to vector<8x32xf32>
    %17 = arith.addf %16, %15 : vector<8x32xf32>
    %18 = arith.divf %16, %17 : vector<8x32xf32>
    %19 = vector.extract_strided_slice %12 {offsets = [0, 32], sizes = [8, 32], strides = [1, 1]} : vector<8x128xf32> to vector<8x32xf32>
    %20 = arith.negf %19 : vector<8x32xf32>
    %21 = math.exp %20 : vector<8x32xf32>
    %cst_15 = arith.constant 1.000000e+00 : f32
    %22 = vector.broadcast %cst_15 : f32 to vector<8x32xf32>
    %23 = arith.addf %22, %21 : vector<8x32xf32>
    %24 = arith.divf %22, %23 : vector<8x32xf32>
    %25 = vector.extract_strided_slice %12 {offsets = [0, 64], sizes = [8, 32], strides = [1, 1]} : vector<8x128xf32> to vector<8x32xf32>
    %26 = math.tanh %25 : vector<8x32xf32>
    %27 = vector.extract_strided_slice %12 {offsets = [0, 96], sizes = [8, 32], strides = [1, 1]} : vector<8x128xf32> to vector<8x32xf32>
    %28 = arith.negf %27 : vector<8x32xf32>
    %29 = math.exp %28 : vector<8x32xf32>
    %cst_16 = arith.constant 1.000000e+00 : f32
    %30 = vector.broadcast %cst_16 : f32 to vector<8x32xf32>
    %31 = arith.addf %30, %29 : vector<8x32xf32>
    %32 = arith.divf %30, %31 : vector<8x32xf32>
    %33 = arith.mulf %24, %9 : vector<8x32xf32>
    %34 = arith.mulf %18, %26 : vector<8x32xf32>
    %35 = arith.addf %33, %34 : vector<8x32xf32>
    %36 = math.tanh %35 : vector<8x32xf32>
    %37 = arith.mulf %32, %36 : vector<8x32xf32>
    %c0_17 = arith.constant 0 : index
    %c0_18 = arith.constant 0 : index
    %38 = vector.load %arg5[%c0_17, %c0_18] : memref<64x32xf32, #tpu.memory_space<vmem>>, vector<8x32xf32>
    tpu.vector_store %arg5[%c0_17, %c0_18], %37 {strides = array<i32>} : memref<64x32xf32, #tpu.memory_space<vmem>>, vector<8x32xf32>,
    %c8 = arith.constant 8 : index
    %c0_19 = arith.constant 0 : index
    %39 = vector.load %arg6[%c8, %c0_19] : memref<64x128xf32, #tpu.memory_space<vmem>>, vector<8x128xf32>
    %cst_20 = arith.constant dense<0.000000e+00> : vector<8x128xf32>
    %40 = tpu.matmul %37, %7, %cst_20 {dimension_numbers = #tpu.dot_dimension_numbers<[1], [0], [0], [1], [0, 0, 1, 1], [], []>} : vector<8x32xf32>, vector<32x128xf32>, vector<8x128xf32> -> vector<8x128xf32>
    %41 = arith.addf %39, %40 : vector<8x128xf32>
    %42 = vector.extract_strided_slice %41 {offsets = [0, 0], sizes = [8, 32], strides = [1, 1]} : vector<8x128xf32> to vector<8x32xf32>
    %43 = arith.negf %42 : vector<8x32xf32>
    %44 = math.exp %43 : vector<8x32xf32>
    %cst_21 = arith.constant 1.000000e+00 : f32
    %45 = vector.broadcast %cst_21 : f32 to vector<8x32xf32>
    %46 = arith.addf %45, %44 : vector<8x32xf32>
    %47 = arith.divf %45, %46 : vector<8x32xf32>
    %48 = vector.extract_strided_slice %41 {offsets = [0, 32], sizes = [8, 32], strides = [1, 1]} : vector<8x128xf32> to vector<8x32xf32>
    %49 = arith.negf %48 : vector<8x32xf32>
    %50 = math.exp %49 : vector<8x32xf32>
    %cst_22 = arith.constant 1.000000e+00 : f32
    %51 = vector.broadcast %cst_22 : f32 to vector<8x32xf32>
    %52 = arith.addf %51, %50 : vector<8x32xf32>
    %53 = arith.divf %51, %52 : vector<8x32xf32>
    %54 = vector.extract_strided_slice %41 {offsets = [0, 64], sizes = [8, 32], strides = [1, 1]} : vector<8x128xf32> to vector<8x32xf32>
    %55 = math.tanh %54 : vector<8x32xf32>
    %56 = vector.extract_strided_slice %41 {offsets = [0, 96], sizes = [8, 32], strides = [1, 1]} : vector<8x128xf32> to vector<8x32xf32>
    %57 = arith.negf %56 : vector<8x32xf32>
    %58 = math.exp %57 : vector<8x32xf32>
    %cst_23 = arith.constant 1.000000e+00 : f32
    %59 = vector.broadcast %cst_23 : f32 to vector<8x32xf32>
    %60 = arith.addf %59, %58 : vector<8x32xf32>
    %61 = arith.divf %59, %60 : vector<8x32xf32>
    %62 = arith.mulf %53, %35 : vector<8x32xf32>
    %63 = arith.mulf %47, %55 : vector<8x32xf32>
    %64 = arith.addf %62, %63 : vector<8x32xf32>
    %65 = math.tanh %64 : vector<8x32xf32>
    %66 = arith.mulf %61, %65 : vector<8x32xf32>
    %c8_24 = arith.constant 8 : index
    %c0_25 = arith.constant 0 : index
    %67 = vector.load %arg5[%c8_24, %c0_25] : memref<64x32xf32, #tpu.memory_space<vmem>>, vector<8x32xf32>
    tpu.vector_store %arg5[%c8_24, %c0_25], %66 {strides = array<i32>} : memref<64x32xf32, #tpu.memory_space<vmem>>, vector<8x32xf32>,
    %c16 = arith.constant 16 : index
    %c0_26 = arith.constant 0 : index
    %68 = vector.load %arg6[%c16, %c0_26] : memref<64x128xf32, #tpu.memory_space<vmem>>, vector<8x128xf32>
    %cst_27 = arith.constant dense<0.000000e+00> : vector<8x128xf32>
    %69 = tpu.matmul %66, %7, %cst_27 {dimension_numbers = #tpu.dot_dimension_numbers<[1], [0], [0], [1], [0, 0, 1, 1], [], []>} : vector<8x32xf32>, vector<32x128xf32>, vector<8x128xf32> -> vector<8x128xf32>
    %70 = arith.addf %68, %69 : vector<8x128xf32>
    %71 = vector.extract_strided_slice %70 {offsets = [0, 0], sizes = [8, 32], strides = [1, 1]} : vector<8x128xf32> to vector<8x32xf32>
    %72 = arith.negf %71 : vector<8x32xf32>
    %73 = math.exp %72 : vector<8x32xf32>
    %cst_28 = arith.constant 1.000000e+00 : f32
    %74 = vector.broadcast %cst_28 : f32 to vector<8x32xf32>
    %75 = arith.addf %74, %73 : vector<8x32xf32>
    %76 = arith.divf %74, %75 : vector<8x32xf32>
    %77 = vector.extract_strided_slice %70 {offsets = [0, 32], sizes = [8, 32], strides = [1, 1]} : vector<8x128xf32> to vector<8x32xf32>
    %78 = arith.negf %77 : vector<8x32xf32>
    %79 = math.exp %78 : vector<8x32xf32>
    %cst_29 = arith.constant 1.000000e+00 : f32
    %80 = vector.broadcast %cst_29 : f32 to vector<8x32xf32>
    %81 = arith.addf %80, %79 : vector<8x32xf32>
    %82 = arith.divf %80, %81 : vector<8x32xf32>
    %83 = vector.extract_strided_slice %70 {offsets = [0, 64], sizes = [8, 32], strides = [1, 1]} : vector<8x128xf32> to vector<8x32xf32>
    %84 = math.tanh %83 : vector<8x32xf32>
    %85 = vector.extract_strided_slice %70 {offsets = [0, 96], sizes = [8, 32], strides = [1, 1]} : vector<8x128xf32> to vector<8x32xf32>
    %86 = arith.negf %85 : vector<8x32xf32>
    %87 = math.exp %86 : vector<8x32xf32>
    %cst_30 = arith.constant 1.000000e+00 : f32
    %88 = vector.broadcast %cst_30 : f32 to vector<8x32xf32>
    %89 = arith.addf %88, %87 : vector<8x32xf32>
    %90 = arith.divf %88, %89 : vector<8x32xf32>
    %91 = arith.mulf %82, %64 : vector<8x32xf32>
    %92 = arith.mulf %76, %84 : vector<8x32xf32>
    %93 = arith.addf %91, %92 : vector<8x32xf32>
    %94 = math.tanh %93 : vector<8x32xf32>
    %95 = arith.mulf %90, %94 : vector<8x32xf32>
    %c16_31 = arith.constant 16 : index
    %c0_32 = arith.constant 0 : index
    %96 = vector.load %arg5[%c16_31, %c0_32] : memref<64x32xf32, #tpu.memory_space<vmem>>, vector<8x32xf32>
    tpu.vector_store %arg5[%c16_31, %c0_32], %95 {strides = array<i32>} : memref<64x32xf32, #tpu.memory_space<vmem>>, vector<8x32xf32>,
    %c24 = arith.constant 24 : index
    %c0_33 = arith.constant 0 : index
    %97 = vector.load %arg6[%c24, %c0_33] : memref<64x128xf32, #tpu.memory_space<vmem>>, vector<8x128xf32>
    %cst_34 = arith.constant dense<0.000000e+00> : vector<8x128xf32>
    %98 = tpu.matmul %95, %7, %cst_34 {dimension_numbers = #tpu.dot_dimension_numbers<[1], [0], [0], [1], [0, 0, 1, 1], [], []>} : vector<8x32xf32>, vector<32x128xf32>, vector<8x128xf32> -> vector<8x128xf32>
    %99 = arith.addf %97, %98 : vector<8x128xf32>
    %100 = vector.extract_strided_slice %99 {offsets = [0, 0], sizes = [8, 32], strides = [1, 1]} : vector<8x128xf32> to vector<8x32xf32>
    %101 = arith.negf %100 : vector<8x32xf32>
    %102 = math.exp %101 : vector<8x32xf32>
    %cst_35 = arith.constant 1.000000e+00 : f32
    %103 = vector.broadcast %cst_35 : f32 to vector<8x32xf32>
    %104 = arith.addf %103, %102 : vector<8x32xf32>
    %105 = arith.divf %103, %104 : vector<8x32xf32>
    %106 = vector.extract_strided_slice %99 {offsets = [0, 32], sizes = [8, 32], strides = [1, 1]} : vector<8x128xf32> to vector<8x32xf32>
    %107 = arith.negf %106 : vector<8x32xf32>
    %108 = math.exp %107 : vector<8x32xf32>
    %cst_36 = arith.constant 1.000000e+00 : f32
    %109 = vector.broadcast %cst_36 : f32 to vector<8x32xf32>
    %110 = arith.addf %109, %108 : vector<8x32xf32>
    %111 = arith.divf %109, %110 : vector<8x32xf32>
    %112 = vector.extract_strided_slice %99 {offsets = [0, 64], sizes = [8, 32], strides = [1, 1]} : vector<8x128xf32> to vector<8x32xf32>
    %113 = math.tanh %112 : vector<8x32xf32>
    %114 = vector.extract_strided_slice %99 {offsets = [0, 96], sizes = [8, 32], strides = [1, 1]} : vector<8x128xf32> to vector<8x32xf32>
    %115 = arith.negf %114 : vector<8x32xf32>
    %116 = math.exp %115 : vector<8x32xf32>
    %cst_37 = arith.constant 1.000000e+00 : f32
    %117 = vector.broadcast %cst_37 : f32 to vector<8x32xf32>
    %118 = arith.addf %117, %116 : vector<8x32xf32>
    %119 = arith.divf %117, %118 : vector<8x32xf32>
    %120 = arith.mulf %111, %93 : vector<8x32xf32>
    %121 = arith.mulf %105, %113 : vector<8x32xf32>
    %122 = arith.addf %120, %121 : vector<8x32xf32>
    %123 = math.tanh %122 : vector<8x32xf32>
    %124 = arith.mulf %119, %123 : vector<8x32xf32>
    %c24_38 = arith.constant 24 : index
    %c0_39 = arith.constant 0 : index
    %125 = vector.load %arg5[%c24_38, %c0_39] : memref<64x32xf32, #tpu.memory_space<vmem>>, vector<8x32xf32>
    tpu.vector_store %arg5[%c24_38, %c0_39], %124 {strides = array<i32>} : memref<64x32xf32, #tpu.memory_space<vmem>>, vector<8x32xf32>,
    %c32 = arith.constant 32 : index
    %c0_40 = arith.constant 0 : index
    %126 = vector.load %arg6[%c32, %c0_40] : memref<64x128xf32, #tpu.memory_space<vmem>>, vector<8x128xf32>
    %cst_41 = arith.constant dense<0.000000e+00> : vector<8x128xf32>
    %127 = tpu.matmul %124, %7, %cst_41 {dimension_numbers = #tpu.dot_dimension_numbers<[1], [0], [0], [1], [0, 0, 1, 1], [], []>} : vector<8x32xf32>, vector<32x128xf32>, vector<8x128xf32> -> vector<8x128xf32>
    %128 = arith.addf %126, %127 : vector<8x128xf32>
    %129 = vector.extract_strided_slice %128 {offsets = [0, 0], sizes = [8, 32], strides = [1, 1]} : vector<8x128xf32> to vector<8x32xf32>
    %130 = arith.negf %129 : vector<8x32xf32>
    %131 = math.exp %130 : vector<8x32xf32>
    %cst_42 = arith.constant 1.000000e+00 : f32
    %132 = vector.broadcast %cst_42 : f32 to vector<8x32xf32>
    %133 = arith.addf %132, %131 : vector<8x32xf32>
    %134 = arith.divf %132, %133 : vector<8x32xf32>
    %135 = vector.extract_strided_slice %128 {offsets = [0, 32], sizes = [8, 32], strides = [1, 1]} : vector<8x128xf32> to vector<8x32xf32>
    %136 = arith.negf %135 : vector<8x32xf32>
    %137 = math.exp %136 : vector<8x32xf32>
    %cst_43 = arith.constant 1.000000e+00 : f32
    %138 = vector.broadcast %cst_43 : f32 to vector<8x32xf32>
    %139 = arith.addf %138, %137 : vector<8x32xf32>
    %140 = arith.divf %138, %139 : vector<8x32xf32>
    %141 = vector.extract_strided_slice %128 {offsets = [0, 64], sizes = [8, 32], strides = [1, 1]} : vector<8x128xf32> to vector<8x32xf32>
    %142 = math.tanh %141 : vector<8x32xf32>
    %143 = vector.extract_strided_slice %128 {offsets = [0, 96], sizes = [8, 32], strides = [1, 1]} : vector<8x128xf32> to vector<8x32xf32>
    %144 = arith.negf %143 : vector<8x32xf32>
    %145 = math.exp %144 : vector<8x32xf32>
    %cst_44 = arith.constant 1.000000e+00 : f32
    %146 = vector.broadcast %cst_44 : f32 to vector<8x32xf32>
    %147 = arith.addf %146, %145 : vector<8x32xf32>
    %148 = arith.divf %146, %147 : vector<8x32xf32>
    %149 = arith.mulf %140, %122 : vector<8x32xf32>
    %150 = arith.mulf %134, %142 : vector<8x32xf32>
    %151 = arith.addf %149, %150 : vector<8x32xf32>
    %152 = math.tanh %151 : vector<8x32xf32>
    %153 = arith.mulf %148, %152 : vector<8x32xf32>
    %c32_45 = arith.constant 32 : index
    %c0_46 = arith.constant 0 : index
    %154 = vector.load %arg5[%c32_45, %c0_46] : memref<64x32xf32, #tpu.memory_space<vmem>>, vector<8x32xf32>
    tpu.vector_store %arg5[%c32_45, %c0_46], %153 {strides = array<i32>} : memref<64x32xf32, #tpu.memory_space<vmem>>, vector<8x32xf32>,
    %c40 = arith.constant 40 : index
    %c0_47 = arith.constant 0 : index
    %155 = vector.load %arg6[%c40, %c0_47] : memref<64x128xf32, #tpu.memory_space<vmem>>, vector<8x128xf32>
    %cst_48 = arith.constant dense<0.000000e+00> : vector<8x128xf32>
    %156 = tpu.matmul %153, %7, %cst_48 {dimension_numbers = #tpu.dot_dimension_numbers<[1], [0], [0], [1], [0, 0, 1, 1], [], []>} : vector<8x32xf32>, vector<32x128xf32>, vector<8x128xf32> -> vector<8x128xf32>
    %157 = arith.addf %155, %156 : vector<8x128xf32>
    %158 = vector.extract_strided_slice %157 {offsets = [0, 0], sizes = [8, 32], strides = [1, 1]} : vector<8x128xf32> to vector<8x32xf32>
    %159 = arith.negf %158 : vector<8x32xf32>
    %160 = math.exp %159 : vector<8x32xf32>
    %cst_49 = arith.constant 1.000000e+00 : f32
    %161 = vector.broadcast %cst_49 : f32 to vector<8x32xf32>
    %162 = arith.addf %161, %160 : vector<8x32xf32>
    %163 = arith.divf %161, %162 : vector<8x32xf32>
    %164 = vector.extract_strided_slice %157 {offsets = [0, 32], sizes = [8, 32], strides = [1, 1]} : vector<8x128xf32> to vector<8x32xf32>
    %165 = arith.negf %164 : vector<8x32xf32>
    %166 = math.exp %165 : vector<8x32xf32>
    %cst_50 = arith.constant 1.000000e+00 : f32
    %167 = vector.broadcast %cst_50 : f32 to vector<8x32xf32>
    %168 = arith.addf %167, %166 : vector<8x32xf32>
    %169 = arith.divf %167, %168 : vector<8x32xf32>
    %170 = vector.extract_strided_slice %157 {offsets = [0, 64], sizes = [8, 32], strides = [1, 1]} : vector<8x128xf32> to vector<8x32xf32>
    %171 = math.tanh %170 : vector<8x32xf32>
    %172 = vector.extract_strided_slice %157 {offsets = [0, 96], sizes = [8, 32], strides = [1, 1]} : vector<8x128xf32> to vector<8x32xf32>
    %173 = arith.negf %172 : vector<8x32xf32>
    %174 = math.exp %173 : vector<8x32xf32>
    %cst_51 = arith.constant 1.000000e+00 : f32
    %175 = vector.broadcast %cst_51 : f32 to vector<8x32xf32>
    %176 = arith.addf %175, %174 : vector<8x32xf32>
    %177 = arith.divf %175, %176 : vector<8x32xf32>
    %178 = arith.mulf %169, %151 : vector<8x32xf32>
    %179 = arith.mulf %163, %171 : vector<8x32xf32>
    %180 = arith.addf %178, %179 : vector<8x32xf32>
    %181 = math.tanh %180 : vector<8x32xf32>
    %182 = arith.mulf %177, %181 : vector<8x32xf32>
    %c40_52 = arith.constant 40 : index
    %c0_53 = arith.constant 0 : index
    %183 = vector.load %arg5[%c40_52, %c0_53] : memref<64x32xf32, #tpu.memory_space<vmem>>, vector<8x32xf32>
    tpu.vector_store %arg5[%c40_52, %c0_53], %182 {strides = array<i32>} : memref<64x32xf32, #tpu.memory_space<vmem>>, vector<8x32xf32>,
    %c48 = arith.constant 48 : index
    %c0_54 = arith.constant 0 : index
    %184 = vector.load %arg6[%c48, %c0_54] : memref<64x128xf32, #tpu.memory_space<vmem>>, vector<8x128xf32>
    %cst_55 = arith.constant dense<0.000000e+00> : vector<8x128xf32>
    %185 = tpu.matmul %182, %7, %cst_55 {dimension_numbers = #tpu.dot_dimension_numbers<[1], [0], [0], [1], [0, 0, 1, 1], [], []>} : vector<8x32xf32>, vector<32x128xf32>, vector<8x128xf32> -> vector<8x128xf32>
    %186 = arith.addf %184, %185 : vector<8x128xf32>
    %187 = vector.extract_strided_slice %186 {offsets = [0, 0], sizes = [8, 32], strides = [1, 1]} : vector<8x128xf32> to vector<8x32xf32>
    %188 = arith.negf %187 : vector<8x32xf32>
    %189 = math.exp %188 : vector<8x32xf32>
    %cst_56 = arith.constant 1.000000e+00 : f32
    %190 = vector.broadcast %cst_56 : f32 to vector<8x32xf32>
    %191 = arith.addf %190, %189 : vector<8x32xf32>
    %192 = arith.divf %190, %191 : vector<8x32xf32>
    %193 = vector.extract_strided_slice %186 {offsets = [0, 32], sizes = [8, 32], strides = [1, 1]} : vector<8x128xf32> to vector<8x32xf32>
    %194 = arith.negf %193 : vector<8x32xf32>
    %195 = math.exp %194 : vector<8x32xf32>
    %cst_57 = arith.constant 1.000000e+00 : f32
    %196 = vector.broadcast %cst_57 : f32 to vector<8x32xf32>
    %197 = arith.addf %196, %195 : vector<8x32xf32>
    %198 = arith.divf %196, %197 : vector<8x32xf32>
    %199 = vector.extract_strided_slice %186 {offsets = [0, 64], sizes = [8, 32], strides = [1, 1]} : vector<8x128xf32> to vector<8x32xf32>
    %200 = math.tanh %199 : vector<8x32xf32>
    %201 = vector.extract_strided_slice %186 {offsets = [0, 96], sizes = [8, 32], strides = [1, 1]} : vector<8x128xf32> to vector<8x32xf32>
    %202 = arith.negf %201 : vector<8x32xf32>
    %203 = math.exp %202 : vector<8x32xf32>
    %cst_58 = arith.constant 1.000000e+00 : f32
    %204 = vector.broadcast %cst_58 : f32 to vector<8x32xf32>
    %205 = arith.addf %204, %203 : vector<8x32xf32>
    %206 = arith.divf %204, %205 : vector<8x32xf32>
    %207 = arith.mulf %198, %180 : vector<8x32xf32>
    %208 = arith.mulf %192, %200 : vector<8x32xf32>
    %209 = arith.addf %207, %208 : vector<8x32xf32>
    %210 = math.tanh %209 : vector<8x32xf32>
    %211 = arith.mulf %206, %210 : vector<8x32xf32>
    %c48_59 = arith.constant 48 : index
    %c0_60 = arith.constant 0 : index
    %212 = vector.load %arg5[%c48_59, %c0_60] : memref<64x32xf32, #tpu.memory_space<vmem>>, vector<8x32xf32>
    tpu.vector_store %arg5[%c48_59, %c0_60], %211 {strides = array<i32>} : memref<64x32xf32, #tpu.memory_space<vmem>>, vector<8x32xf32>,
    %c56 = arith.constant 56 : index
    %c0_61 = arith.constant 0 : index
    %213 = vector.load %arg6[%c56, %c0_61] : memref<64x128xf32, #tpu.memory_space<vmem>>, vector<8x128xf32>
    %cst_62 = arith.constant dense<0.000000e+00> : vector<8x128xf32>
    %214 = tpu.matmul %211, %7, %cst_62 {dimension_numbers = #tpu.dot_dimension_numbers<[1], [0], [0], [1], [0, 0, 1, 1], [], []>} : vector<8x32xf32>, vector<32x128xf32>, vector<8x128xf32> -> vector<8x128xf32>
    %215 = arith.addf %213, %214 : vector<8x128xf32>
    %216 = vector.extract_strided_slice %215 {offsets = [0, 0], sizes = [8, 32], strides = [1, 1]} : vector<8x128xf32> to vector<8x32xf32>
    %217 = arith.negf %216 : vector<8x32xf32>
    %218 = math.exp %217 : vector<8x32xf32>
    %cst_63 = arith.constant 1.000000e+00 : f32
    %219 = vector.broadcast %cst_63 : f32 to vector<8x32xf32>
    %220 = arith.addf %219, %218 : vector<8x32xf32>
    %221 = arith.divf %219, %220 : vector<8x32xf32>
    %222 = vector.extract_strided_slice %215 {offsets = [0, 32], sizes = [8, 32], strides = [1, 1]} : vector<8x128xf32> to vector<8x32xf32>
    %223 = arith.negf %222 : vector<8x32xf32>
    %224 = math.exp %223 : vector<8x32xf32>
    %cst_64 = arith.constant 1.000000e+00 : f32
    %225 = vector.broadcast %cst_64 : f32 to vector<8x32xf32>
    %226 = arith.addf %225, %224 : vector<8x32xf32>
    %227 = arith.divf %225, %226 : vector<8x32xf32>
    %228 = vector.extract_strided_slice %215 {offsets = [0, 64], sizes = [8, 32], strides = [1, 1]} : vector<8x128xf32> to vector<8x32xf32>
    %229 = math.tanh %228 : vector<8x32xf32>
    %230 = vector.extract_strided_slice %215 {offsets = [0, 96], sizes = [8, 32], strides = [1, 1]} : vector<8x128xf32> to vector<8x32xf32>
    %231 = arith.negf %230 : vector<8x32xf32>
    %232 = math.exp %231 : vector<8x32xf32>
    %cst_65 = arith.constant 1.000000e+00 : f32
    %233 = vector.broadcast %cst_65 : f32 to vector<8x32xf32>
    %234 = arith.addf %233, %232 : vector<8x32xf32>
    %235 = arith.divf %233, %234 : vector<8x32xf32>
    %236 = arith.mulf %227, %209 : vector<8x32xf32>
    %237 = arith.mulf %221, %229 : vector<8x32xf32>
    %238 = arith.addf %236, %237 : vector<8x32xf32>
    %239 = math.tanh %238 : vector<8x32xf32>
    %240 = arith.mulf %235, %239 : vector<8x32xf32>
    %c56_66 = arith.constant 56 : index
    %c0_67 = arith.constant 0 : index
    %241 = vector.load %arg5[%c56_66, %c0_67] : memref<64x32xf32, #tpu.memory_space<vmem>>, vector<8x32xf32>
    tpu.vector_store %arg5[%c56_66, %c0_67], %240 {strides = array<i32>} : memref<64x32xf32, #tpu.memory_space<vmem>>, vector<8x32xf32>,
    return
  }
  func.func @transform_0(%arg0: i32) -> (i32, i32) {
    %c0_i32 = arith.constant 0 : i32
    %c0_i32_0 = arith.constant 0 : i32
    %c0_i32_1 = arith.constant 0 : i32
    return %c0_i32, %c0_i32_0 : i32, i32
  }
  func.func @transform_1(%arg0: i32) -> (i32, i32) {
    %c0_i32 = arith.constant 0 : i32
    %c0_i32_0 = arith.constant 0 : i32
    %c0_i32_1 = arith.constant 0 : i32
    return %c0_i32, %c0_i32_0 : i32, i32
  }
  func.func @transform_2(%arg0: i32) -> (i32, i32) {
    %c0_i32 = arith.constant 0 : i32
    %c0_i32_0 = arith.constant 0 : i32
    %c0_i32_1 = arith.constant 0 : i32
    return %c0_i32, %c0_i32_0 : i32, i32
  }
  func.func @transform_3(%arg0: i32) -> (i32, i32) {
    %c0_i32 = arith.constant 0 : i32
    %c0_i32_0 = arith.constant 0 : i32
    %c0_i32_1 = arith.constant 0 : i32
    return %c0_i32, %c0_i32_0 : i32, i32
  }
  func.func @transform_4(%arg0: i32) -> (i32, i32) {
    %c0_i32 = arith.constant 0 : i32
    %c0_i32_0 = arith.constant 0 : i32
    %c0_i32_1 = arith.constant 0 : i32
    return %c0_i32, %c0_i32_0 : i32, i32
  }
}

module attributes {stable_mosaic.version = 11 : i64} {
  func.func @_fc_out_kernel(%arg0: i32, %arg1: memref<64x32xbf16, #tpu.memory_space<vmem>>, %arg2: memref<32x128xbf16, #tpu.memory_space<vmem>>, %arg3: memref<1x128xf32, #tpu.memory_space<vmem>>, %arg4: memref<64x128xf32, #tpu.memory_space<vmem>>) attributes {dimension_semantics = [#tpu.dimension_semantics<parallel>], iteration_bounds = array<i64: 1>, scalar_prefetch = 0 : i64, scratch_operands = 0 : i64, tpu.core_type = #tpu.core_type<tc>, window_params = [{pipeline_mode = #tpu.pipeline_mode<synchronous>, transform_indices = @transform_0, window_bounds = array<i64: 64, 32>}, {transform_indices = @transform_1, window_bounds = array<i64: 32, 128>}, {transform_indices = @transform_2, window_bounds = array<i64: 1, 128>}, {transform_indices = @transform_3, window_bounds = array<i64: 64, 128>}]} {
    %c0 = arith.constant 0 : index
    %c0_0 = arith.constant 0 : index
    %0 = vector.load %arg1[%c0, %c0_0] : memref<64x32xbf16, #tpu.memory_space<vmem>>, vector<64x32xbf16>
    %c0_1 = arith.constant 0 : index
    %c0_2 = arith.constant 0 : index
    %1 = vector.load %arg2[%c0_1, %c0_2] : memref<32x128xbf16, #tpu.memory_space<vmem>>, vector<32x128xbf16>
    %cst = arith.constant dense<0.000000e+00> : vector<64x128xf32>
    %2 = tpu.matmul %0, %1, %cst {dimension_numbers = #tpu.dot_dimension_numbers<[1], [0], [0], [1], [0, 0, 1, 1], [], []>} : vector<64x32xbf16>, vector<32x128xbf16>, vector<64x128xf32> -> vector<64x128xf32>
    %c0_3 = arith.constant 0 : index
    %c0_4 = arith.constant 0 : index
    %3 = vector.load %arg3[%c0_3, %c0_4] : memref<1x128xf32, #tpu.memory_space<vmem>>, vector<1x128xf32>
    %4 = vector.broadcast %3 : vector<1x128xf32> to vector<64x128xf32>
    %5 = arith.addf %2, %4 : vector<64x128xf32>
    %c0_5 = arith.constant 0 : index
    %c0_6 = arith.constant 0 : index
    %6 = vector.load %arg4[%c0_5, %c0_6] : memref<64x128xf32, #tpu.memory_space<vmem>>, vector<64x128xf32>
    tpu.vector_store %arg4[%c0_5, %c0_6], %5 {strides = array<i32>} : memref<64x128xf32, #tpu.memory_space<vmem>>, vector<64x128xf32>,
    return
  }
  func.func @transform_0(%arg0: i32) -> (i32, i32) {
    %c0_i32 = arith.constant 0 : i32
    %c0_i32_0 = arith.constant 0 : i32
    %c0_i32_1 = arith.constant 0 : i32
    return %c0_i32, %c0_i32_0 : i32, i32
  }
  func.func @transform_1(%arg0: i32) -> (i32, i32) {
    %c0_i32 = arith.constant 0 : i32
    %c0_i32_0 = arith.constant 0 : i32
    return %c0_i32, %arg0 : i32, i32
  }
  func.func @transform_2(%arg0: i32) -> (i32, i32) {
    %c0_i32 = arith.constant 0 : i32
    %c0_i32_0 = arith.constant 0 : i32
    return %c0_i32, %arg0 : i32, i32
  }
  func.func @transform_3(%arg0: i32) -> (i32, i32) {
    %c0_i32 = arith.constant 0 : i32
    %c0_i32_0 = arith.constant 0 : i32
    return %c0_i32, %arg0 : i32, i32
  }
}

</mosaic_0001>

<bundles_post_ra>
// kernel: decoder_rnn_forward.3
= control target key start
LH: loop header
LB: loop body
LE: loop exit
PB: predicated region body
PF: predicated region fallthrough
CT: control target
= control target key end

     0   :  { %vm67_vm0 = vcmask 261120   ;;  %s291_s0 = inlined_call_operand.vmem [shape: bf16[64,32], index: 0, kind: input, shape index: {}]   ;;  %s292_s1 = inlined_call_operand.vmem [shape: bf16[32,128], index: 1, kind: input, shape index: {}]   ;;  %s293_s2 = inlined_call_operand.vmem [shape: f32[1,128], index: 2, kind: input, shape index: {}]   ;;  %s294_s3 = inlined_call_operand.hbm [shape: f32[64,128], index: 3, kind: output, shape index: {}]  }
   0x1   :  { %v205_v0 = vld [vmem:[%s292_s1] sm:$0xff]   ;;  %v206_v1 = vld [vmem:[%s292_s1 + $0x8] sm:$0xff]   ;;  %v208_v3 = vld [vmem:[%s291_s0 + $0x10] sm:$0xff]  }
   0x2   :  { %186 = vmatprep.subr.bf16.mxu0 %v205_v0  ;;  %198 = vmatprep.subr.bf16.mxu1 %v205_v0  ;;  %v207_v2 = vld [vmem:[%s291_s0] sm:$0xff]   ;;  %v209_v4 = vld [vmem:[%s291_s0 + $0x8] sm:$0xff]   ;;  %v210_v5 = vld [vmem:[%s291_s0 + $0x18] sm:$0xff]  }
   0x3   :  { %187 = vmatpush3.bf16.msra.mxu0 %v205_v0  ;;  %200 = vmatpush3.bf16.msra.mxu1 %v205_v0 }
   0x4   :  { %188 = vmatprep.subr.bf16.mxu0 %v206_v1  ;;  %199 = vmatprep.subr.bf16.mxu1 %v206_v1 }
   0x5   :  { %190 = vmatprep.mubr.msk.bf16.mxu0 %vm67_vm0, %v207_v2  ;;  %194 = vmatprep.mubr.msk.bf16.mxu1 %vm67_vm0, %v208_v3 }
   0x6   :  { %8 = vsyncpa [#allocation3], 0  ;;  %v169_v6 = vld [vmem:[%s293_s2] ss:$0 sm:$0xff]  ;;  %s235_s25 = smov [#allocation2]  }
   0x7   :  { %189 = vmatpush3.bf16.msra.mxu0 %v206_v1  ;;  %201 = vmatpush3.bf16.msra.mxu1 %v206_v1  ;;  %s158_s26 = sshll.u32 %s235_s25, 4  ;;  %s159_s26 = int_to_ptr.vmem [resolvable:$true] %s158_s26 }
   0x8   :  { %s211_s0 = scalar_lea.vmem %s159_s26, 1024  ;;  %p216_p1 = scmp.lt.s32.totalorder %s159_s26, %s159_s26 }
   0x9   :  { %p212_p0 = scmp.ne.s32.totalorder %s159_s26, %s211_s0  ;;  %p217_p2 = scmp.lt.s32.totalorder %s211_s0, %s211_s0 }
   0xa   :  { %191 = vmatmul.mubr.msk.bf16.vlgmr.msra.gmra.mrb[0].mxu0 %vm67_vm0, %v209_v4  ;;  %195 = vmatmul.mubr.msk.bf16.vlgmr.msra.gmra.mrb[0].mxu1 %vm67_vm0, %v210_v5 }
   0xb   :  { %p218_p3 = por %p217_p2, %p216_p1 }
   0xd   :  { %p219_p4 = pnand %p218_p3, %p212_p0 }
  0xdd   :  { %v192_v7 = vpop.f32.mrb[0].mxu0  ;;  %v196_v8 = vpop.f32.mrb[0].mxu1 }
  0xde   :  { %v123_v9 = vadd.f32 %v192_v7, %v169_v6  ;;  %v139_v10 = vadd.f32 %v196_v8, %v169_v6  ;;  %v114_v11 = vpop.f32.mrb[1].mxu0  ;;  %v130_v12 = vpop.f32.mrb[1].mxu1 }
  0xdf   :  { %v115_v13 = vadd.f32 %v169_v6, %v114_v11  ;;  %v131_v14 = vadd.f32 %v169_v6, %v130_v12  ;;  %v193_v15 = vpop.f32.mrb[2].mxu0  ;;  %v197_v16 = vpop.f32.mrb[2].mxu1 }
  0xe0   :  { %147 = vst [vmem:[#allocation2 + $0x10] sm:$0xff] %v123_v9  ;;  %151 = vst [vmem:[#allocation2 + $0x30] sm:$0xff] %v139_v10  ;;  %v126_v17 = vadd.f32 %v193_v15, %v169_v6  ;;  %v142_v18 = vadd.f32 %v197_v16, %v169_v6  ;;  %v117_v19 = vpop.f32.mrb[3].mxu0  ;;  %v133_v20 = vpop.f32.mrb[3].mxu1 }
  0xe1   :  { %145 = vst [vmem:[#allocation2] sm:$0xff] %v115_v13  ;;  %149 = vst [vmem:[#allocation2 + $0x20] sm:$0xff] %v131_v14  ;;  %v118_v21 = vadd.f32 %v169_v6, %v117_v19  ;;  %v134_v22 = vadd.f32 %v169_v6, %v133_v20 }
  0xe2   :  { %148 = vst [vmem:[#allocation2 + $0x18] sm:$0xff] %v126_v17  ;;  %152 = vst [vmem:[#allocation2 + $0x38] sm:$0xff] %v142_v18 }
  0xe3   :  { %146 = vst [vmem:[#allocation2 + $0x8] sm:$0xff] %v118_v21  ;;  %150 = vst [vmem:[#allocation2 + $0x28] sm:$0xff] %v134_v22 }
  0xe4   :  { %222 = shalt.err (!%p219_p4)
}
  0xe5   :  { %s223_s28 = scalar_lea.hbm %s294_s3, 1024 }
  0xe6   :  { %p224_p5 = scmp.ne.s32.totalorder %s294_s3, %s223_s28  ;;  %p227_p6 = scmp.lt.u32.totalorder %s223_s28, %s294_s3 }
  0xe8   :  { %p229_p7 = pnand %p227_p6, %p224_p5 }
  0xea   :  { %232 = shalt.err (!%p229_p7)
}
  0xeb   :  { %s236_s6 = smov 128   ;;  %s237_s7 = smov 8  }
  0xec   :  { %164 = dma.vmem_to_hbm [thread:$0]  %s159_s26, 1024, %s294_s3, [#allocation3], %s236_s6, %s236_s6, %s237_s7  }
  0xed   :  { %233 = dma.done.wait [#allocation3], 1024  }
  0xee   :  { %234 = vsyncadd [#allocation3], 4294966272 }
  0xef   :  { %168 = vsyncpa [#allocation3], 1 }

// kernel: decoder_rnn_forward.2
= control target key start
LH: loop header
LB: loop body
LE: loop exit
PB: predicated region body
PF: predicated region fallthrough
CT: control target
= control target key end

     0   :  { %v1316_v2 = vmov 0.0|0.0   ;;  %vm36_vm0 = vcmask 261120   ;;  %vm1317_vm1 = vmmov 0   ;;  %v1318_v4 = vmov 0.0   ;;  %s1319_s9 = smov 64   ;;  %s1551_s1 = inlined_call_operand.vmem [shape: f32[32,128], index: 1, kind: input, shape index: {}]   ;;  %s1552_s2 = inlined_call_operand.vmem [shape: f32[32,128], index: 2, kind: input, shape index: {}]   ;;  %s1553_s0 = inlined_call_operand.vmem [shape: f32[64,32], index: 0, kind: input, shape index: {}]   ;;  %s1554_s3 = inlined_call_operand.vmem [shape: f32[1,128], index: 3, kind: input, shape index: {}]   ;;  %s1555_s4 = inlined_call_operand.vmem [shape: f32[64,32], index: 4, kind: output, shape index: {}]  }
   0x1   :  { %v25_v0 = vld [vmem:[%s1551_s1] sm:$0xff]  ;;  %v26_v1 = vld [vmem:[%s1551_s1 + $0x8] sm:$0xff]  ;;  %1199 = vmatprep.subr.bf16.mxu1 %v1316_v2  ;;  %1111 = vmatprep.mubr.msk.f32.mxu1 %vm1317_vm1, %v1318_v4  ;;  %v27_v7 = vld [vmem:[%s1551_s1 + $0x10] sm:$0xff] }
   0x2   :  { %v174_v3 = vld [vmem:[%s1552_s2] sm:$0xff]  ;;  %v1191_v5 = vpack.c.bf16 %v26_v1, %v25_v0  ;;  %v175_v6 = vld [vmem:[%s1552_s2 + $0x8] sm:$0xff]  ;;  %v28_v8 = vld [vmem:[%s1551_s1 + $0x18] sm:$0xff] }
   0x3   :  { %v1367_v9 = vpack.c.bf16 %v175_v6, %v174_v3  ;;  %v1195_v10 = vpack.c.bf16 %v28_v8, %v27_v7  ;;  %v17_v11 = vld [vmem:[%s1553_s0] sm:$0xff]  ;;  %v176_v12 = vld [vmem:[%s1552_s2 + $0x10] sm:$0xff]  ;;  %v177_v13 = vld [vmem:[%s1552_s2 + $0x18] sm:$0xff] }
   0x4   :  { %1192 = vmatprep.subr.bf16.mxu0 %v1191_v5  ;;  %1091 = vmatprep.mubr.msk.f32.mxu0 %vm36_vm0, %v17_v11  ;;  %v1380_v14 = vpack.c.bf16 %v177_v13, %v176_v12  ;;  %v18_v15 = vld [vmem:[%s1553_s0 + $0x8] sm:$0xff]  ;;  %v1404_v16 = vld [vmem:[%s1554_s3] ss:$0 sm:$0xff]  ;;  %s1320_s3 = smov 32   ;;  %v19_v51 = vld [vmem:[%s1553_s0 + $0x10] sm:$0xff] }
   0x5   :  { %1194 = vmatpush3.bf16.msra.mxu0 %v1191_v5  ;;  %1201 = vmatpush3.bf16.msra.mxu1 %v1367_v9  ;;  %v20_v52 = vld [vmem:[%s1553_s0 + $0x18] sm:$0xff]  ;;  %v21_v53 = vld [vmem:[%s1553_s0 + $0x20] sm:$0xff]  ;;  %v22_v54 = vld [vmem:[%s1553_s0 + $0x28] sm:$0xff] }
   0x6   :  { %1196 = vmatprep.subr.bf16.mxu0 %v1195_v10  ;;  %1202 = vmatprep.subr.bf16.mxu1 %v1316_v2  ;;  %v23_v55 = vld [vmem:[%s1553_s0 + $0x30] sm:$0xff]  ;;  %v24_v56 = vld [vmem:[%s1553_s0 + $0x38] sm:$0xff] }
   0x9   :  { %1198 = vmatpush3.bf16.msra.mxu0 %v1195_v10  ;;  %1204 = vmatpush3.bf16.msra.mxu1 %v1380_v14 }
   0xa   :  { %1205 = vmatprep.subr.bf16.mxu1 %v1316_v2  ;;  %1211 = vmatprep.subr.bf16.mxu0 %v1316_v2 }
   0xc   :  { %1092 = vmatmul.mubr.msk.f32.vlgmr.msra.gmra.mrb[0].mxu0 %vm36_vm0, %v18_v15  ;;  %1112 = vmatmul.mubr.f32.vlgmr.msra.gmra.mrb[0].mxu1 %v1318_v4 }
   0xd   :  { %1207 = vmatpush3.bf16.msra.mxu1 %v1367_v9  ;;  %1122 = vmatprep.mubr.msk.f32.mxu1 %vm1317_vm1, %v1318_v4 }
   0xe   :  { %1208 = vmatprep.subr.bf16.mxu1 %v1316_v2  ;;  %1213 = vmatpush3.bf16.msra.mxu0 %v1367_v9 }
   0xf   :  { %1214 = vmatprep.subr.bf16.mxu0 %v1316_v2  ;;  %1094 = vmatprep.mubr.msk.f32.mxu0 %vm36_vm0, %v19_v51 }
  0x10   :  { %1095 = vmatmul.mubr.msk.f32.gmra.mrb[2].mxu0 %vm36_vm0, %v20_v52 }
  0x11   :  { %1210 = vmatpush3.bf16.msra.mxu1 %v1380_v14  ;;  %1097 = vmatprep.mubr.msk.f32.mxu0 %vm36_vm0, %v21_v53 }
  0x12   :  { %1216 = vmatpush3.bf16.msra.mxu0 %v1380_v14  ;;  %1217 = vmatprep.subr.bf16.mxu1 %v1316_v2 }
  0x13   :  { %1223 = vmatprep.subr.bf16.mxu0 %v1316_v2 }
  0x14   :  { %1098 = vmatmul.mubr.msk.f32.gmra.mrb[4].mxu0 %vm36_vm0, %v22_v54 }
  0x15   :  { %1100 = vmatprep.mubr.msk.f32.mxu0 %vm36_vm0, %v23_v55 }
  0x18   :  { %1101 = vmatmul.mubr.msk.f32.gmra.mrb[6].mxu0 %vm36_vm0, %v24_v56 }
  0x19   :  { %1133 = vmatprep.mubr.msk.f32.mxu0 %vm1317_vm1, %v1318_v4 }
  0xdf   :  { %v1093_v17 = vpop.f32.mrb[0].mxu0  ;;  %v248_v18 = vpop.f32.mrb[0].mxu1 }
  0xe0   :  { %v127_v19 = vpop.f32.mrb[1].mxu0  ;;  %v1113_v20 = vpop.f32.mrb[1].mxu1  ;;  %v133_v37 = vadd.f32 %v1093_v17, %v1404_v16 }
  0xe1   :  { %v128_v21 = vadd.f32 %v1404_v16, %v127_v19 }
  0xe3   :  { %v252_v22 = vadd.f32 %v248_v18, %v128_v21  ;;  %v1096_v60 = vpop.f32.mrb[2].mxu0 }
  0xe4   :  { %v137_v61 = vpop.f32.mrb[3].mxu0 }
  0xe5   :  { %1252 = vtanh.f32 %v252_v22  ;;  %v1016_v24 = vmul.f32 -1.442695, %v252_v22  ;;  %v138_v5 = vadd.f32 %v1404_v16, %v137_v61 }
  0xe7   :  { %1254 = vpow2.f32 %v1016_v24  ;;  %v1453_v62 = vpop.f32.mrb[4].mxu0 }
  0xe8   :  { %v1455_v63 = vpop.f32.mrb[5].mxu0 }
  0xeb   :  { %v1457_v0 = vpop.f32.mrb[6].mxu0 }
  0xec   :  { %v1459_v1 = vpop.f32.mrb[7].mxu0 }
  0xef   :  { %v1253_v23 = vpop.eup %1252 }
  0xf0   :  { %262 = vrot.lane.b32.xlu0 %v1253_v23, %s1319_s9 }
  0xf1   :  { %v1255_v25 = vpop.eup %1254 }
  0xf2   :  { %v256_v26 = vadd.f32 1.0, %v1255_v25 }
  0xf4   :  { %1256 = vrcp.f32 %v256_v26  ;;  %v143_v26 = vadd.f32 %v1096_v60, %v1404_v16 }
  0xfe   :  { %v1257_v27 = vpop.eup %1256 }
  0xff   :  { %v260_v30 = vmul.f32 0.0, %v1257_v27 }
 0x162   :  { %v263_v28 = vpop.permute.xlu0 %262 }
 0x163   :  { %v265_v29 = vmul.f32 %v1257_v27, %v263_v28 }
 0x165   :  { %267 = vrot.lane.b32.xlu0 %v265_v29, %s1320_s3 }
 0x1d7   :  { %v268_v31 = vpop.permute.xlu0 %267 }
 0x1d8   :  { %v270_v32 = vadd.f32 %v268_v31, %v260_v30 }
 0x1da   :  { %1258 = vtanh.f32 %v270_v32 }
 0x1e4   :  { %v1259_v33 = vpop.eup %1258 }
 0x1e5   :  { %273 = vrot.lane.b32.xlu1 %v1259_v33, %s1319_s9 }
 0x257   :  { %v274_v34 = vpop.permute.xlu1 %273 }
 0x258   :  { %v276_v35 = vmul.f32 %v1257_v27, %v274_v34 }
 0x25a   :  { %278 = vrot.lane.b32.xlu1 %v276_v35, %s1320_s3 }
 0x2cc   :  { %v279_v36 = vpop.permute.xlu1 %278 }
 0x2cd   :  { %281 = vst.msk [vmem:[%s1555_s4] sm:$0xff] %vm36_vm0, %v279_v36  ;;  %1123 = vmatmul.mubr.msk.f32.vlgmr.msra.gmra.mrb[2].mxu1 %vm36_vm0, %v279_v36 }
 0x2ce   :  { %1219 = vmatpush3.bf16.msra.mxu1 %v1367_v9  ;;  %1144 = vmatprep.mubr.msk.f32.mxu1 %vm1317_vm1, %v1318_v4 }
 0x2cf   :  { %1220 = vmatprep.subr.bf16.mxu1 %v1316_v2 }
 0x2d2   :  { %1222 = vmatpush3.bf16.msra.mxu1 %v1380_v14 }
 0x2d3   :  { %1229 = vmatprep.subr.bf16.mxu1 %v1316_v2 }
 0x3a0   :  { %v351_v38 = vpop.f32.mrb[2].mxu1 }
 0x3a1   :  { %v355_v39 = vadd.f32 %v351_v38, %v133_v37  ;;  %v1124_v40 = vpop.f32.mrb[3].mxu1 }
 0x3a3   :  { %1260 = vtanh.f32 %v355_v39  ;;  %v1018_v42 = vmul.f32 -1.442695, %v355_v39 }
 0x3a5   :  { %1262 = vpow2.f32 %v1018_v42 }
 0x3ad   :  { %v1261_v41 = vpop.eup %1260 }
 0x3ae   :  { %365 = vrot.lane.b32.xlu0 %v1261_v41, %s1319_s9 }
 0x3af   :  { %v1263_v43 = vpop.eup %1262 }
 0x3b0   :  { %v359_v44 = vadd.f32 1.0, %v1263_v43 }
 0x3b2   :  { %1264 = vrcp.f32 %v359_v44  ;;  %v148_v44 = vadd.f32 %v1404_v16, %v1455_v63  ;;  %v153_v63 = vadd.f32 %v1453_v62, %v1404_v16 }
 0x3bc   :  { %v1265_v45 = vpop.eup %1264 }
 0x3bd   :  { %v363_v48 = vmul.f32 %v1265_v45, %v270_v32 }
 0x420   :  { %v366_v46 = vpop.permute.xlu0 %365 }
 0x421   :  { %v368_v47 = vmul.f32 %v1265_v45, %v366_v46 }
 0x423   :  { %370 = vrot.lane.b32.xlu1 %v368_v47, %s1320_s3 }
 0x495   :  { %v371_v49 = vpop.permute.xlu1 %370 }
 0x496   :  { %v373_v50 = vadd.f32 %v371_v49, %v363_v48 }
 0x498   :  { %1266 = vtanh.f32 %v373_v50 }
 0x4a2   :  { %v1267_v57 = vpop.eup %1266 }
 0x4a3   :  { %376 = vrot.lane.b32.xlu0 %v1267_v57, %s1319_s9 }
 0x515   :  { %v377_v58 = vpop.permute.xlu0 %376 }
 0x516   :  { %v379_v59 = vmul.f32 %v1265_v45, %v377_v58 }
 0x518   :  { %381 = vrot.lane.b32.xlu1 %v379_v59, %s1320_s3 }
 0x58a   :  { %v382_v3 = vpop.permute.xlu1 %381 }
 0x58b   :  { %384 = vst.msk [vmem:[%s1555_s4 + $0x8] sm:$0xff] %vm36_vm0, %v382_v3  ;;  %1134 = vmatmul.mubr.msk.f32.vlgmr.msra.gmra.mrb[8].mxu0 %vm36_vm0, %v382_v3 }
 0x58c   :  { %1225 = vmatpush3.bf16.msra.mxu0 %v1367_v9  ;;  %1155 = vmatprep.mubr.msk.f32.mxu0 %vm1317_vm1, %v1318_v4 }
 0x58d   :  { %1226 = vmatprep.subr.bf16.mxu0 %v1316_v2 }
 0x590   :  { %1228 = vmatpush3.bf16.msra.mxu0 %v1380_v14 }
 0x591   :  { %1235 = vmatprep.subr.bf16.mxu0 %v1316_v2 }
 0x65e   :  { %v454_v6 = vpop.f32.mrb[8].mxu0 }
 0x65f   :  { %v458_v7 = vadd.f32 %v454_v6, %v138_v5  ;;  %v1135_v8 = vpop.f32.mrb[9].mxu0 }
 0x661   :  { %1268 = vtanh.f32 %v458_v7  ;;  %v1020_v11 = vmul.f32 -1.442695, %v458_v7 }
 0x663   :  { %1270 = vpow2.f32 %v1020_v11 }
 0x66b   :  { %v1269_v10 = vpop.eup %1268 }
 0x66c   :  { %468 = vrot.lane.b32.xlu0 %v1269_v10, %s1319_s9 }
 0x66d   :  { %v1271_v12 = vpop.eup %1270 }
 0x66e   :  { %v462_v13 = vadd.f32 1.0, %v1271_v12 }
 0x670   :  { %1272 = vrcp.f32 %v462_v13 }
 0x67a   :  { %v1273_v15 = vpop.eup %1272 }
 0x67b   :  { %v466_v19 = vmul.f32 %v1273_v15, %v373_v50 }
 0x6de   :  { %v469_v17 = vpop.permute.xlu0 %468 }
 0x6df   :  { %v471_v18 = vmul.f32 %v1273_v15, %v469_v17 }
 0x6e1   :  { %473 = vrot.lane.b32.xlu1 %v471_v18, %s1320_s3 }
 0x753   :  { %v474_v20 = vpop.permute.xlu1 %473 }
 0x754   :  { %v476_v21 = vadd.f32 %v474_v20, %v466_v19  ;;  %v158_v19 = vadd.f32 %v1404_v16, %v1459_v1 }
 0x756   :  { %1274 = vtanh.f32 %v476_v21 }
 0x760   :  { %v1275_v22 = vpop.eup %1274 }
 0x761   :  { %479 = vrot.lane.b32.xlu0 %v1275_v22, %s1319_s9 }
 0x7d3   :  { %v480_v23 = vpop.permute.xlu0 %479 }
 0x7d4   :  { %v482_v24 = vmul.f32 %v1273_v15, %v480_v23 }
 0x7d6   :  { %484 = vrot.lane.b32.xlu1 %v482_v24, %s1320_s3 }
 0x848   :  { %v485_v25 = vpop.permute.xlu1 %484 }
 0x849   :  { %487 = vst.msk [vmem:[%s1555_s4 + $0x10] sm:$0xff] %vm36_vm0, %v485_v25  ;;  %1145 = vmatmul.mubr.msk.f32.vlgmr.msra.gmra.mrb[4].mxu1 %vm36_vm0, %v485_v25 }
 0x84a   :  { %1231 = vmatpush3.bf16.msra.mxu1 %v1367_v9  ;;  %1166 = vmatprep.mubr.msk.f32.mxu1 %vm1317_vm1, %v1318_v4 }
 0x84b   :  { %1232 = vmatprep.subr.bf16.mxu1 %v1316_v2 }
 0x84e   :  { %1234 = vmatpush3.bf16.msra.mxu1 %v1380_v14 }
 0x84f   :  { %1241 = vmatprep.subr.bf16.mxu1 %v1316_v2 }
 0x91c   :  { %v557_v27 = vpop.f32.mrb[4].mxu1 }
 0x91d   :  { %v561_v28 = vadd.f32 %v557_v27, %v143_v26  ;;  %v1146_v29 = vpop.f32.mrb[5].mxu1 }
 0x91f   :  { %1276 = vtanh.f32 %v561_v28  ;;  %v1022_v31 = vmul.f32 -1.442695, %v561_v28 }
 0x921   :  { %1278 = vpow2.f32 %v1022_v31 }
 0x929   :  { %v1277_v30 = vpop.eup %1276 }
 0x92a   :  { %571 = vrot.lane.b32.xlu0 %v1277_v30, %s1319_s9 }
 0x92b   :  { %v1279_v32 = vpop.eup %1278 }
 0x92c   :  { %v565_v33 = vadd.f32 1.0, %v1279_v32 }
 0x92e   :  { %1280 = vrcp.f32 %v565_v33 }
 0x938   :  { %v1281_v34 = vpop.eup %1280 }
 0x939   :  { %v569_v37 = vmul.f32 %v1281_v34, %v476_v21 }
 0x99c   :  { %v572_v35 = vpop.permute.xlu0 %571 }
 0x99d   :  { %v574_v36 = vmul.f32 %v1281_v34, %v572_v35 }
 0x99f   :  { %576 = vrot.lane.b32.xlu1 %v574_v36, %s1320_s3  ;;  %v163_v36 = vadd.f32 %v1457_v0, %v1404_v16 }
 0xa11   :  { %v577_v38 = vpop.permute.xlu1 %576 }
 0xa12   :  { %v579_v39 = vadd.f32 %v577_v38, %v569_v37 }
 0xa14   :  { %1282 = vtanh.f32 %v579_v39 }
 0xa1e   :  { %v1283_v40 = vpop.eup %1282 }
 0xa1f   :  { %582 = vrot.lane.b32.xlu0 %v1283_v40, %s1319_s9 }
 0xa91   :  { %v583_v41 = vpop.permute.xlu0 %582 }
 0xa92   :  { %v585_v42 = vmul.f32 %v1281_v34, %v583_v41 }
 0xa94   :  { %587 = vrot.lane.b32.xlu1 %v585_v42, %s1320_s3 }
 0xb06   :  { %v588_v43 = vpop.permute.xlu1 %587 }
 0xb07   :  { %590 = vst.msk [vmem:[%s1555_s4 + $0x18] sm:$0xff] %vm36_vm0, %v588_v43  ;;  %1156 = vmatmul.mubr.msk.f32.vlgmr.msra.gmra.mrb[10].mxu0 %vm36_vm0, %v588_v43 }
 0xb08   :  { %1237 = vmatpush3.bf16.msra.mxu0 %v1367_v9  ;;  %1177 = vmatprep.mubr.msk.f32.mxu0 %vm1317_vm1, %v1318_v4 }
 0xb09   :  { %1238 = vmatprep.subr.bf16.mxu0 %v1316_v2 }
 0xb0c   :  { %1240 = vmatpush3.bf16.msra.mxu0 %v1380_v14 }
 0xbda   :  { %v660_v45 = vpop.f32.mrb[10].mxu0 }
 0xbdb   :  { %v664_v46 = vadd.f32 %v660_v45, %v148_v44  ;;  %v1157_v47 = vpop.f32.mrb[11].mxu0 }
 0xbdd   :  { %1284 = vtanh.f32 %v664_v46  ;;  %v1024_v49 = vmul.f32 -1.442695, %v664_v46 }
 0xbdf   :  { %1286 = vpow2.f32 %v1024_v49 }
 0xbe7   :  { %v1285_v48 = vpop.eup %1284 }
 0xbe8   :  { %674 = vrot.lane.b32.xlu0 %v1285_v48, %s1319_s9 }
 0xbe9   :  { %v1287_v50 = vpop.eup %1286 }
 0xbea   :  { %v668_v51 = vadd.f32 1.0, %v1287_v50 }
 0xbec   :  { %1288 = vrcp.f32 %v668_v51 }
 0xbf6   :  { %v1289_v52 = vpop.eup %1288 }
 0xbf7   :  { %v672_v55 = vmul.f32 %v1289_v52, %v579_v39 }
 0xc5a   :  { %v675_v53 = vpop.permute.xlu0 %674 }
 0xc5b   :  { %v677_v54 = vmul.f32 %v1289_v52, %v675_v53 }
 0xc5d   :  { %679 = vrot.lane.b32.xlu1 %v677_v54, %s1320_s3 }
 0xccf   :  { %v680_v56 = vpop.permute.xlu1 %679 }
 0xcd0   :  { %v682_v57 = vadd.f32 %v680_v56, %v672_v55 }
 0xcd2   :  { %1290 = vtanh.f32 %v682_v57 }
 0xcdc   :  { %v1291_v58 = vpop.eup %1290 }
 0xcdd   :  { %685 = vrot.lane.b32.xlu0 %v1291_v58, %s1319_s9 }
 0xd4f   :  { %v686_v59 = vpop.permute.xlu0 %685 }
 0xd50   :  { %v688_v60 = vmul.f32 %v1289_v52, %v686_v59 }
 0xd52   :  { %690 = vrot.lane.b32.xlu1 %v688_v60, %s1320_s3 }
 0xdc4   :  { %v691_v61 = vpop.permute.xlu1 %690 }
 0xdc5   :  { %693 = vst.msk [vmem:[%s1555_s4 + $0x20] sm:$0xff] %vm36_vm0, %v691_v61  ;;  %1167 = vmatmul.mubr.msk.f32.vlgmr.msra.gmra.mrb[6].mxu1 %vm36_vm0, %v691_v61 }
 0xdc6   :  { %1243 = vmatpush3.bf16.msra.mxu1 %v1367_v9  ;;  %1188 = vmatprep.mubr.msk.f32.mxu1 %vm1317_vm1, %v1318_v4 }
 0xdc7   :  { %1244 = vmatprep.subr.bf16.mxu1 %v1316_v2 }
 0xdca   :  { %1246 = vmatpush3.bf16.msra.mxu1 %v1380_v14 }
 0xe98   :  { %v763_v3 = vpop.f32.mrb[6].mxu1 }
 0xe99   :  { %v767_v5 = vadd.f32 %v763_v3, %v153_v63  ;;  %v1168_v6 = vpop.f32.mrb[7].mxu1 }
 0xe9b   :  { %1292 = vtanh.f32 %v767_v5  ;;  %v1026_v8 = vmul.f32 -1.442695, %v767_v5 }
 0xe9d   :  { %1294 = vpow2.f32 %v1026_v8 }
 0xea5   :  { %v1293_v7 = vpop.eup %1292 }
 0xea6   :  { %777 = vrot.lane.b32.xlu0 %v1293_v7, %s1319_s9 }
 0xea7   :  { %v1295_v9 = vpop.eup %1294 }
 0xea8   :  { %v771_v10 = vadd.f32 1.0, %v1295_v9 }
 0xeaa   :  { %1296 = vrcp.f32 %v771_v10 }
 0xeb4   :  { %v1297_v4 = vpop.eup %1296 }
 0xeb5   :  { %v775_v14 = vmul.f32 %v1297_v4, %v682_v57 }
 0xf18   :  { %v778_v11 = vpop.permute.xlu0 %777 }
 0xf19   :  { %v780_v2 = vmul.f32 %v1297_v4, %v778_v11 }
 0xf1b   :  { %782 = vrot.lane.b32.xlu1 %v780_v2, %s1320_s3 }
 0xf8d   :  { %v783_v12 = vpop.permute.xlu1 %782 }
 0xf8e   :  { %v785_v62 = vadd.f32 %v783_v12, %v775_v14 }
 0xf90   :  { %1298 = vtanh.f32 %v785_v62 }
 0xf9a   :  { %v1299_v13 = vpop.eup %1298 }
 0xf9b   :  { %788 = vrot.lane.b32.xlu0 %v1299_v13, %s1319_s9 }
0x100d   :  { %v789_v15 = vpop.permute.xlu0 %788 }
0x100e   :  { %v791_v17 = vmul.f32 %v1297_v4, %v789_v15 }
0x1010   :  { %793 = vrot.lane.b32.xlu1 %v791_v17, %s1320_s3 }
0x1082   :  { %v794_v18 = vpop.permute.xlu1 %793 }
0x1083   :  { %796 = vst.msk [vmem:[%s1555_s4 + $0x28] sm:$0xff] %vm36_vm0, %v794_v18  ;;  %1178 = vmatmul.mubr.msk.f32.vlgmr.msra.gmra.mrb[12].mxu0 %vm36_vm0, %v794_v18 }
0x1156   :  { %v866_v20 = vpop.f32.mrb[12].mxu0 }
0x1157   :  { %v870_v21 = vadd.f32 %v866_v20, %v158_v19  ;;  %v1179_v22 = vpop.f32.mrb[13].mxu0 }
0x1159   :  { %1300 = vtanh.f32 %v870_v21  ;;  %v1028_v24 = vmul.f32 -1.442695, %v870_v21 }
0x115b   :  { %1302 = vpow2.f32 %v1028_v24 }
0x1163   :  { %v1301_v23 = vpop.eup %1300 }
0x1164   :  { %880 = vrot.lane.b32.xlu0 %v1301_v23, %s1319_s9 }
0x1165   :  { %v1303_v25 = vpop.eup %1302 }
0x1166   :  { %v874_v26 = vadd.f32 1.0, %v1303_v25 }
0x1168   :  { %1304 = vrcp.f32 %v874_v26 }
0x1172   :  { %v1305_v27 = vpop.eup %1304 }
0x1173   :  { %v878_v30 = vmul.f32 %v1305_v27, %v785_v62 }
0x11d6   :  { %v881_v28 = vpop.permute.xlu0 %880 }
0x11d7   :  { %v883_v29 = vmul.f32 %v1305_v27, %v881_v28 }
0x11d9   :  { %885 = vrot.lane.b32.xlu1 %v883_v29, %s1320_s3 }
0x124b   :  { %v886_v31 = vpop.permute.xlu1 %885 }
0x124c   :  { %v888_v1 = vadd.f32 %v886_v31, %v878_v30 }
0x124e   :  { %1306 = vtanh.f32 %v888_v1 }
0x1258   :  { %v1307_v32 = vpop.eup %1306 }
0x1259   :  { %891 = vrot.lane.b32.xlu0 %v1307_v32, %s1319_s9 }
0x12cb   :  { %v892_v33 = vpop.permute.xlu0 %891 }
0x12cc   :  { %v894_v34 = vmul.f32 %v1305_v27, %v892_v33 }
0x12ce   :  { %896 = vrot.lane.b32.xlu1 %v894_v34, %s1320_s3 }
0x1340   :  { %v897_v35 = vpop.permute.xlu1 %896 }
0x1341   :  { %899 = vst.msk [vmem:[%s1555_s4 + $0x30] sm:$0xff] %vm36_vm0, %v897_v35  ;;  %1189 = vmatmul.mubr.msk.f32.vlgmr.msra.gmra.mrb[8].mxu1 %vm36_vm0, %v897_v35 }
0x1414   :  { %v969_v37 = vpop.f32.mrb[8].mxu1 }
0x1415   :  { %v973_v38 = vadd.f32 %v969_v37, %v163_v36  ;;  %v1190_v39 = vpop.f32.mrb[9].mxu1 }
0x1417   :  { %1308 = vtanh.f32 %v973_v38  ;;  %v1030_v41 = vmul.f32 -1.442695, %v973_v38 }
0x1419   :  { %1310 = vpow2.f32 %v1030_v41 }
0x1421   :  { %v1309_v40 = vpop.eup %1308 }
0x1422   :  { %983 = vrot.lane.b32.xlu0 %v1309_v40, %s1319_s9 }
0x1423   :  { %v1311_v42 = vpop.eup %1310 }
0x1424   :  { %v977_v43 = vadd.f32 1.0, %v1311_v42 }
0x1426   :  { %1312 = vrcp.f32 %v977_v43 }
0x1430   :  { %v1313_v44 = vpop.eup %1312 }
0x1431   :  { %v981_v47 = vmul.f32 %v1313_v44, %v888_v1 }
0x1494   :  { %v984_v45 = vpop.permute.xlu0 %983 }
0x1495   :  { %v986_v46 = vmul.f32 %v1313_v44, %v984_v45 }
0x1497   :  { %988 = vrot.lane.b32.xlu1 %v986_v46, %s1320_s3 }
0x1509   :  { %v989_v48 = vpop.permute.xlu1 %988 }
0x150a   :  { %v991_v16 = vadd.f32 %v989_v48, %v981_v47 }
0x150c   :  { %1314 = vtanh.f32 %v991_v16 }
0x1516   :  { %v1315_v0 = vpop.eup %1314 }
0x1517   :  { %994 = vrot.lane.b32.xlu0 %v1315_v0, %s1319_s9 }
0x1589   :  { %v995_v49 = vpop.permute.xlu0 %994 }
0x158a   :  { %v997_v50 = vmul.f32 %v1313_v44, %v995_v49 }
0x158c   :  { %999 = vrot.lane.b32.xlu1 %v997_v50, %s1320_s3 }
0x15fe   :  { %v1000_v51 = vpop.permute.xlu1 %999 }
0x15ff   :  { %1002 = vst.msk [vmem:[%s1555_s4 + $0x38] sm:$0xff] %vm36_vm0, %v1000_v51 }

</bundles_post_ra>
